<compile_context>
chip_gen: v5e
topology: v5e:2x2
jax: 0.10.0
libtpu: 0.0.40
codegen_flags: <defaults>
</compile_context>

<pallas_src>
import functools

import jax
import jax.numpy as jnp
from jax.experimental import pallas as pl
from jax.experimental.pallas import tpu as pltpu


# ----------------------------------------------------------------------------
# Kernels
# ----------------------------------------------------------------------------
def _pointmap_l1_reduce_kernel(pred_ref, tgt_ref, lsum_ref, msum_ref, *, eps):
    """Accumulate sum(masked |pred-tgt|) and sum(mask) into (8,128) partials."""
    t = pl.program_id(2)

    @pl.when(t == 0)
    def _():
        lsum_ref[...] = jnp.zeros_like(lsum_ref)
        msum_ref[...] = jnp.zeros_like(msum_ref)

    pred = pred_ref[...].astype(jnp.float32)            # (1, C, S, 128)
    tgt = tgt_ref[...].astype(jnp.float32)              # (1, C, S, 128)
    s = pred_ref.shape[2]

    # Valid mask from channel 0 only; padded tail lanes carry target <= eps,
    # so they are masked out here with no extra per-step remainder work.
    valid = tgt[0, 0] > eps                             # (S, 128) bool
    # Masked L1 via select (no cast+multiply on the hot path).
    loss = jnp.where(valid[None, None], jnp.abs(pred - tgt), 0.0)  # (1,C,S,128)

    # Per-lane/sublane partial sums: reductions over leading axes only (pure
    # VPU vreg adds).  The single cross-lane reduce happens once, in the
    # wrapper, over the tiny (B, P, 8, 128) accumulator outputs.
    l_part = loss.sum(axis=(0, 1)).reshape(s // 8, 8, 128).sum(axis=0)      # (8,128)
    m_part = jnp.where(valid, 1.0, 0.0).reshape(s // 8, 8, 128).sum(axis=0)  # (8,128)
    lsum_ref[...] += l_part[None, None]
    msum_ref[...] += m_part[None, None]


def _pointmap_l1_elem_kernel(pred_ref, tgt_ref, loss_ref, *, eps):
    """Elementwise masked L1 for reduction='none'."""
    pred = pred_ref[...].astype(jnp.float32)            # (1, C, S, 128)
    tgt = tgt_ref[...].astype(jnp.float32)
    valid = tgt[:, 0:1] > eps                           # (1, 1, S, 128)
    loss_ref[...] = jnp.where(valid, jnp.abs(pred - tgt), 0.0).astype(loss_ref.dtype)


# ----------------------------------------------------------------------------
# Tiling / VMEM budgeting helpers
# ----------------------------------------------------------------------------
def _cdiv(a, b):
    return -(-a // b)


def _round_up(x, m):
    return _cdiv(x, m) * m


def _sublane_mult(itemsize):
    # Native sublane tile granularity: f32 -> 8, bf16/f16 -> 16, 8-bit -> 32.
    return {4: 8, 2: 16, 1: 32}.get(int(itemsize), 8)


def _vmem_capacity_bytes():
    try:
        return int(pltpu.get_tpu_info().vmem_capacity_bytes)
    except Exception:
        return 64 << 20   # conservative fallback (v7x per-core size)


def _plan(hw, c, in_itemsizes, out_itemsize, target_block_bytes):
    """Pick S (sublanes per block), n_sub tiles, P parallel splits, padded HW,
    and the vmem limit, per-generation."""
    all_isz = tuple(in_itemsizes) + ((out_itemsize,) if out_itemsize else ())
    sub_mult = max(_sublane_mult(i) for i in all_isz)

    budget = _vmem_capacity_bytes() * 3 // 4            # ~48 MiB v7x, ~96 MiB v5e/v6e
    max_isz = max(all_isz)
    # Bytes of pipelined (double-buffered) footprint per unit of S.
    per_s_pipeline = 128 * c * 2 * (sum(in_itemsizes) + out_itemsize)
    s_target = target_block_bytes // (128 * c * max_isz)
    s_fit = max(1, (budget - (8 << 20)) // per_s_pipeline)
    s_max = max(sub_mult, (min(s_target, s_fit) // sub_mult) * sub_mult)

    hw128 = _cdiv(hw, 128)
    if hw128 <= s_max:
        p, n_sub, s = 1, 1, _round_up(hw128, sub_mult)
    else:
        n_sub = _cdiv(hw128, s_max)
        p = 2 if n_sub >= 2 else 1       # lets megacore split the tile axis (v7x)
        n_sub = _round_up(n_sub, p)
        s = _round_up(_cdiv(hw128, n_sub), sub_mult)
    hw_pad = n_sub * s * 128

    block_bytes = 128 * c * s * (sum(in_itemsizes) + out_itemsize)
    vmem_limit = int(min(budget, max(2 * block_bytes + (8 << 20), 16 << 20)))
    return s, n_sub, p, hw_pad, vmem_limit


# ----------------------------------------------------------------------------
# Public wrapper (PointmapL1Loss.forward, normalize=False)
# ----------------------------------------------------------------------------
def pointmap_l1_loss(pred, target, weight=None, avg_factor=None,
                     reduction='mean', loss_weight=1.0, eps=-100.0,
                     normalize=False, none_out_dtype=None,
                     target_block_bytes=4 * 1024 * 1024):
    assert pred.shape == target.shape, (
        f'The shapes of pred ({pred.shape}) and target ({target.shape}) are mismatched')
    assert reduction in ('none', 'mean', 'sum')
    if normalize:
        # TODO(synk): normalize=True divides (B,C,H,W) by a (B,)-shaped tensor,
        # which only broadcasts in PyTorch when W==B; not reproduced here.
        raise NotImplementedError('normalize=True is not supported')

    B, C, H, W = target.shape
    HW = H * W
    eps = float(eps)

    # 'none' output in the input dtype by default (cuts HBM write traffic).
    # Pass none_out_dtype=jnp.float32 for strict PyTorch promotion parity.
    out_dtype = pred.dtype if none_out_dtype is None else jnp.dtype(none_out_dtype)
    in_isz = (pred.dtype.itemsize, target.dtype.itemsize)
    out_isz = out_dtype.itemsize if reduction == 'none' else 0

    S, n_sub, P, HW_pad, vmem_limit = _plan(HW, C, in_isz, out_isz,
                                            target_block_bytes)

    # Native-dtype reshape to lane-dense 4D layout.
    pred3 = pred.reshape(B, C, HW)
    tgt3 = target.reshape(B, C, HW)
    if HW_pad != HW:
        # Pad the spatial tail once in the wrapper (target with a value <= eps)
        # so the kernels never need in-loop remainder masking.
        pad = HW_pad - HW
        pred3 = jnp.pad(pred3, ((0, 0), (0, 0), (0, pad)))
        tgt3 = jnp.pad(tgt3, ((0, 0), (0, 0), (0, pad)),
                       constant_values=eps - 1.0)
    pred4 = pred3.reshape(B, C, HW_pad // 128, 128)
    tgt4 = tgt3.reshape(B, C, HW_pad // 128, 128)

    hbm_bytes_in = B * C * HW_pad * sum(in_isz)

    if reduction == 'none':
        kernel = functools.partial(_pointmap_l1_elem_kernel, eps=eps)
        loss4 = pl.pallas_call(
            kernel,
            grid=(B, n_sub),
            in_specs=[pl.BlockSpec((1, C, S, 128), lambda b, t: (b, 0, t, 0)),
                      pl.BlockSpec((1, C, S, 128), lambda b, t: (b, 0, t, 0))],
            out_specs=pl.BlockSpec((1, C, S, 128), lambda b, t: (b, 0, t, 0)),
            out_shape=jax.ShapeDtypeStruct((B, C, HW_pad // 128, 128), out_dtype),
            compiler_params=pltpu.CompilerParams(
                dimension_semantics=("parallel", "parallel"),
                vmem_limit_bytes=vmem_limit),
            cost_estimate=pl.CostEstimate(
                flops=4 * B * C * HW_pad, transcendentals=0,
                bytes_accessed=hbm_bytes_in + B * C * HW_pad * out_isz),
        )(pred4, tgt4)
        loss = loss4.reshape(B, C, HW_pad)
        if HW_pad != HW:
            loss = loss[:, :, :HW]
        loss = loss.reshape(B, C, H, W)
    else:
        # Reduce-only kernel: never writes the (B,C,HW) loss back to HBM.
        n_per_p = n_sub // P
        kernel = functools.partial(_pointmap_l1_reduce_kernel, eps=eps)
        in_map = lambda b, p, t: (b, 0, p * n_per_p + t, 0)
        out_map = lambda b, p, t: (b, p, 0, 0)
        lsum, msum = pl.pallas_call(
            kernel,
            grid=(B, P, n_per_p),
            in_specs=[pl.BlockSpec((1, C, S, 128), in_map),
                      pl.BlockSpec((1, C, S, 128), in_map)],
            out_specs=[pl.BlockSpec((1, 1, 8, 128), out_map),
                       pl.BlockSpec((1, 1, 8, 128), out_map)],
            out_shape=[jax.ShapeDtypeStruct((B, P, 8, 128), jnp.float32),
                       jax.ShapeDtypeStruct((B, P, 8, 128), jnp.float32)],
            compiler_params=pltpu.CompilerParams(
                dimension_semantics=("parallel", "parallel", "arbitrary"),
                vmem_limit_bytes=vmem_limit),
            cost_estimate=pl.CostEstimate(
                flops=5 * B * C * HW_pad, transcendentals=0,
                bytes_accessed=hbm_bytes_in + 2 * B * P * 8 * 128 * 4),
        )(pred4, tgt4)
        lsum_tot = jnp.sum(lsum)
        msum_tot = jnp.sum(msum)
        if reduction == 'mean':
            loss = lsum_tot / jnp.maximum(msum_tot, 1.0)
        else:  # 'sum'
            loss = lsum_tot

    # weight_reduce_loss glue — mirrors the module exactly: it reduces first,
    # then applies weight / avg_factor to the (possibly already-scalar) loss.
    if weight is not None:
        loss = loss * weight
    if avg_factor is None:
        if reduction == 'mean':
            loss = jnp.mean(loss)
        elif reduction == 'sum':
            loss = jnp.sum(loss)
    else:
        if reduction == 'mean':
            loss = jnp.sum(loss) / (avg_factor + jnp.finfo(jnp.float32).eps)
        elif reduction != 'none':
            raise ValueError('avg_factor can not be used with reduction="sum"')

    return loss * loss_weight


# ----------------------------------------------------------------------------
# Pure-JAX reference (normalize=False path of the PyTorch module)
# ----------------------------------------------------------------------------
def _reference(pred, target, eps=-100.0, reduction='mean', loss_weight=1.0):
    pred = pred.astype(jnp.float32)
    target = target.astype(jnp.float32)
    mask = (target > eps).astype(jnp.float32)[:, 0:1, :, :]
    loss = jnp.abs(pred - target) * mask
    if reduction == 'mean':
        loss = loss.sum() / jnp.maximum(mask.sum(), 1.0)
    elif reduction == 'sum':
        loss = loss.sum()
    return loss * loss_weight


if __name__ == "__main__":
    key = jax.random.PRNGKey(0)
    k1, k2, k3, k4 = jax.random.split(key, 4)

    # Case 1: small NCHW f32, single spatial tile (HW padded 256 -> 1024).
    B, C, H, W = 2, 4, 16, 16
    pred = jax.random.normal(k1, (B, C, H, W), dtype=jnp.float32)
    target = jax.random.normal(k2, (B, C, H, W), dtype=jnp.float32)
    target = target.at[:, 0, :4, :4].set(-1000.0)   # invalid pixels (mask = 0)

    out_mean = jax.block_until_ready(pointmap_l1_loss(pred, target, reduction='mean'))
    out_sum = jax.block_until_ready(pointmap_l1_loss(pred, target, reduction='sum'))
    out_none = jax.block_until_ready(pointmap_l1_loss(pred, target, reduction='none'))

    assert out_none.shape == (B, C, H, W)
    assert jnp.allclose(out_mean, _reference(pred, target, reduction='mean'),
                        rtol=1e-5, atol=1e-5)
    assert jnp.allclose(out_sum, _reference(pred, target, reduction='sum'),
                        rtol=1e-5, atol=1e-5)
    assert jnp.allclose(out_none, _reference(pred, target, reduction='none'),
                        rtol=1e-5, atol=1e-5)

    # Case 2: bf16 inputs, non-128-aligned spatial size, tiny block budget to
    # force multiple spatial tiles, the 2-way parallel split of the tile axis,
    # the spatial-tail padding path, cross-tile accumulation and the bf16
    # 'none' output.
    B2, C2, H2, W2 = 2, 3, 65, 65
    pred2 = jax.random.normal(k3, (B2, C2, H2, W2), dtype=jnp.float32).astype(jnp.bfloat16)
    target2 = jax.random.normal(k4, (B2, C2, H2, W2), dtype=jnp.float32).astype(jnp.bfloat16)
    target2 = target2.at[:, 0, :5, :7].set(-1000.0)

    out2_mean = jax.block_until_ready(
        pointmap_l1_loss(pred2, target2, reduction='mean', target_block_bytes=16 * 1024))
    out2_sum = jax.block_until_ready(
        pointmap_l1_loss(pred2, target2, reduction='sum', target_block_bytes=16 * 1024))
    out2_none = jax.block_until_ready(
        pointmap_l1_loss(pred2, target2, reduction='none', target_block_bytes=16 * 1024))

    assert out2_none.shape == (B2, C2, H2, W2)
    assert out2_none.dtype == pred2.dtype
    assert jnp.allclose(out2_mean, _reference(pred2, target2, reduction='mean'),
                        rtol=1e-4, atol=1e-4)
    assert jnp.allclose(out2_sum, _reference(pred2, target2, reduction='sum'),
                        rtol=1e-4, atol=1e-3)
    assert jnp.allclose(out2_none.astype(jnp.float32),
                        _reference(pred2, target2, reduction='none'),
                        rtol=1e-2, atol=1e-2)

    print("KERNEL_OK")
</pallas_src>

<mosaic_0001>
module attributes {stable_mosaic.version = 11 : i64} {
  func.func @_pointmap_l1_reduce_kernel(%arg0: i32, %arg1: i32, %arg2: i32, %arg3: memref<1x4x8x128xf32, #tpu.memory_space<vmem>>, %arg4: memref<1x4x8x128xf32, #tpu.memory_space<vmem>>, %arg5: memref<1x1x8x128xf32, #tpu.memory_space<vmem>>, %arg6: memref<1x1x8x128xf32, #tpu.memory_space<vmem>>) attributes {dimension_semantics = [#tpu.dimension_semantics<parallel>, #tpu.dimension_semantics<parallel>, #tpu.dimension_semantics<arbitrary>], iteration_bounds = array<i64: 2, 1, 1>, scalar_prefetch = 0 : i64, scratch_operands = 0 : i64, tpu.core_type = #tpu.core_type<tc>, window_params = [{transform_indices = @transform_0, window_bounds = array<i64: 1, 4, 8, 128>}, {transform_indices = @transform_1, window_bounds = array<i64: 1, 4, 8, 128>}, {transform_indices = @transform_2, window_bounds = array<i64: 1, 1, 8, 128>}, {transform_indices = @transform_3, window_bounds = array<i64: 1, 1, 8, 128>}]} {
    %c0_i32 = arith.constant 0 : i32
    %0 = arith.cmpi eq, %arg2, %c0_i32 : i32
    %1 = arith.extui %0 : i1 to i32
    %c0_i32_0 = arith.constant 0 : i32
    %2 = arith.cmpi ne, %1, %c0_i32_0 : i32
    scf.if %2 {
      %cst_30 = arith.constant 0.000000e+00 : f32
      %32 = vector.broadcast %cst_30 : f32 to vector<1x1x8x128xf32>
      %c0_31 = arith.constant 0 : index
      %c0_32 = arith.constant 0 : index
      %c0_33 = arith.constant 0 : index
      %c0_34 = arith.constant 0 : index
      %33 = vector.load %arg5[%c0_31, %c0_32, %c0_33, %c0_34] : memref<1x1x8x128xf32, #tpu.memory_space<vmem>>, vector<1x1x8x128xf32>
      tpu.vector_store %arg5[%c0_31, %c0_32, %c0_33, %c0_34], %32 {strides = array<i32>} : memref<1x1x8x128xf32, #tpu.memory_space<vmem>>, vector<1x1x8x128xf32>,
      %cst_35 = arith.constant 0.000000e+00 : f32
      %34 = vector.broadcast %cst_35 : f32 to vector<1x1x8x128xf32>
      %c0_36 = arith.constant 0 : index
      %c0_37 = arith.constant 0 : index
      %c0_38 = arith.constant 0 : index
      %c0_39 = arith.constant 0 : index
      %35 = vector.load %arg6[%c0_36, %c0_37, %c0_38, %c0_39] : memref<1x1x8x128xf32, #tpu.memory_space<vmem>>, vector<1x1x8x128xf32>
      tpu.vector_store %arg6[%c0_36, %c0_37, %c0_38, %c0_39], %34 {strides = array<i32>} : memref<1x1x8x128xf32, #tpu.memory_space<vmem>>, vector<1x1x8x128xf32>,
    } else {
    }
    %c0 = arith.constant 0 : index
    %c0_1 = arith.constant 0 : index
    %c0_2 = arith.constant 0 : index
    %c0_3 = arith.constant 0 : index
    %3 = vector.load %arg3[%c0, %c0_1, %c0_2, %c0_3] : memref<1x4x8x128xf32, #tpu.memory_space<vmem>>, vector<1x4x8x128xf32>
    %c0_4 = arith.constant 0 : index
    %c0_5 = arith.constant 0 : index
    %c0_6 = arith.constant 0 : index
    %c0_7 = arith.constant 0 : index
    %4 = vector.load %arg4[%c0_4, %c0_5, %c0_6, %c0_7] : memref<1x4x8x128xf32, #tpu.memory_space<vmem>>, vector<1x4x8x128xf32>
    %5 = vector.extract_strided_slice %4 {offsets = [0, 0, 0, 0], sizes = [1, 1, 8, 128], strides = [1, 1, 1, 1]} : vector<1x4x8x128xf32> to vector<1x1x8x128xf32>
    %6 = vector.shape_cast %5 : vector<1x1x8x128xf32> to vector<8x128xf32>
    %cst = arith.constant -1.000000e+02 : f32
    %7 = vector.broadcast %cst : f32 to vector<8x128xf32>
    %8 = arith.cmpf ogt, %6, %7 : vector<8x128xf32>
    %9 = vector.shape_cast %8 : vector<8x128xi1> to vector<1x1x8x128xi1>
    %10 = arith.subf %3, %4 : vector<1x4x8x128xf32>
    %11 = math.absf %10 : vector<1x4x8x128xf32>
    %cst_8 = arith.constant 0.000000e+00 : f32
    %12 = vector.shape_cast %9 : vector<1x1x8x128xi1> to vector<1x1x8x128xi1>
    %13 = vector.broadcast %12 : vector<1x1x8x128xi1> to vector<1x4x8x128xi1>
    %14 = vector.broadcast %cst_8 : f32 to vector<1x4x8x128xf32>
    %15 = arith.select %13, %11, %14 : vector<1x4x8x128xi1>, vector<1x4x8x128xf32>
    %cst_9 = arith.constant dense<0.000000e+00> : vector<8x128xf32>
    %16 = vector.multi_reduction <add>, %15, %cst_9 [0, 1] : vector<1x4x8x128xf32> to vector<8x128xf32>
    %17 = vector.shape_cast %16 : vector<8x128xf32> to vector<1x8x128xf32>
    %cst_10 = arith.constant dense<0.000000e+00> : vector<8x128xf32>
    %18 = vector.multi_reduction <add>, %17, %cst_10 [0] : vector<1x8x128xf32> to vector<8x128xf32>
    %cst_11 = arith.constant 1.000000e+00 : f32
    %cst_12 = arith.constant 0.000000e+00 : f32
    %19 = vector.broadcast %cst_11 : f32 to vector<8x128xf32>
    %20 = vector.broadcast %cst_12 : f32 to vector<8x128xf32>
    %21 = arith.select %8, %19, %20 : vector<8x128xi1>, vector<8x128xf32>
    %22 = vector.shape_cast %21 : vector<8x128xf32> to vector<1x8x128xf32>
    %cst_13 = arith.constant dense<0.000000e+00> : vector<8x128xf32>
    %23 = vector.multi_reduction <add>, %22, %cst_13 [0] : vector<1x8x128xf32> to vector<8x128xf32>
    %c0_14 = arith.constant 0 : index
    %c0_15 = arith.constant 0 : index
    %c0_16 = arith.constant 0 : index
    %c0_17 = arith.constant 0 : index
    %24 = vector.load %arg5[%c0_14, %c0_15, %c0_16, %c0_17] : memref<1x1x8x128xf32, #tpu.memory_space<vmem>>, vector<1x1x8x128xf32>
    %25 = vector.shape_cast %18 : vector<8x128xf32> to vector<1x1x8x128xf32>
    %26 = arith.addf %24, %25 : vector<1x1x8x128xf32>
    %c0_18 = arith.constant 0 : index
    %c0_19 = arith.constant 0 : index
    %c0_20 = arith.constant 0 : index
    %c0_21 = arith.constant 0 : index
    %27 = vector.load %arg5[%c0_18, %c0_19, %c0_20, %c0_21] : memref<1x1x8x128xf32, #tpu.memory_space<vmem>>, vector<1x1x8x128xf32>
    tpu.vector_store %arg5[%c0_18, %c0_19, %c0_20, %c0_21], %26 {strides = array<i32>} : memref<1x1x8x128xf32, #tpu.memory_space<vmem>>, vector<1x1x8x128xf32>,
    %c0_22 = arith.constant 0 : index
    %c0_23 = arith.constant 0 : index
    %c0_24 = arith.constant 0 : index
    %c0_25 = arith.constant 0 : index
    %28 = vector.load %arg6[%c0_22, %c0_23, %c0_24, %c0_25] : memref<1x1x8x128xf32, #tpu.memory_space<vmem>>, vector<1x1x8x128xf32>
    %29 = vector.shape_cast %23 : vector<8x128xf32> to vector<1x1x8x128xf32>
    %30 = arith.addf %28, %29 : vector<1x1x8x128xf32>
    %c0_26 = arith.constant 0 : index
    %c0_27 = arith.constant 0 : index
    %c0_28 = arith.constant 0 : index
    %c0_29 = arith.constant 0 : index
    %31 = vector.load %arg6[%c0_26, %c0_27, %c0_28, %c0_29] : memref<1x1x8x128xf32, #tpu.memory_space<vmem>>, vector<1x1x8x128xf32>
    tpu.vector_store %arg6[%c0_26, %c0_27, %c0_28, %c0_29], %30 {strides = array<i32>} : memref<1x1x8x128xf32, #tpu.memory_space<vmem>>, vector<1x1x8x128xf32>,
    return
  }
  func.func @transform_0(%arg0: i32, %arg1: i32, %arg2: i32) -> (i32, i32, i32, i32) {
    %c1_i32 = arith.constant 1 : i32
    %0 = arith.muli %arg1, %c1_i32 : i32
    %1 = arith.addi %0, %arg2 : i32
    %c0_i32 = arith.constant 0 : i32
    %c0_i32_0 = arith.constant 0 : i32
    %c0_i32_1 = arith.constant 0 : i32
    return %arg0, %c0_i32, %1, %c0_i32_0 : i32, i32, i32, i32
  }
  func.func @transform_1(%arg0: i32, %arg1: i32, %arg2: i32) -> (i32, i32, i32, i32) {
    %c1_i32 = arith.constant 1 : i32
    %0 = arith.muli %arg1, %c1_i32 : i32
    %1 = arith.addi %0, %arg2 : i32
    %c0_i32 = arith.constant 0 : i32
    %c0_i32_0 = arith.constant 0 : i32
    %c0_i32_1 = arith.constant 0 : i32
    return %arg0, %c0_i32, %1, %c0_i32_0 : i32, i32, i32, i32
  }
  func.func @transform_2(%arg0: i32, %arg1: i32, %arg2: i32) -> (i32, i32, i32, i32) {
    %c0_i32 = arith.constant 0 : i32
    %c0_i32_0 = arith.constant 0 : i32
    %c0_i32_1 = arith.constant 0 : i32
    return %arg0, %arg1, %c0_i32, %c0_i32_0 : i32, i32, i32, i32
  }
  func.func @transform_3(%arg0: i32, %arg1: i32, %arg2: i32) -> (i32, i32, i32, i32) {
    %c0_i32 = arith.constant 0 : i32
    %c0_i32_0 = arith.constant 0 : i32
    %c0_i32_1 = arith.constant 0 : i32
    return %arg0, %arg1, %c0_i32, %c0_i32_0 : i32, i32, i32, i32
  }
}

</mosaic_0001>

<bundles_post_ra>
// kernel: tpu_custom_call.1
= control target key start
LH: loop header
LB: loop body
LE: loop exit
PB: predicated region body
PF: predicated region fallthrough
CT: control target
= control target key end

     0   :  { %s974_s0 = inlined_call_operand.hbm [shape: f32[2,4,8,128], index: 0, kind: input, shape index: {}]   ;;  %s975_s1 = inlined_call_operand.hbm [shape: f32[2,4,8,128], index: 1, kind: input, shape index: {}]   ;;  %s976_s2 = inlined_call_operand.hbm [shape: f32[2,1,8,128], index: 2, kind: output, shape index: {0}]   ;;  %s977_s3 = inlined_call_operand.hbm [shape: f32[2,1,8,128], index: 3, kind: output, shape index: {1}]  }
   0x1   :  { %978 = sst [smem:[#allocation14_spill]] %s974_s0 }
   0x2   :  { %9 = vsyncpa [#allocation3], 0 }
   0x3   :  { %11 = vsyncpa [#allocation3 + $0x1], 0 }
   0x4   :  { %12 = vsyncpa [#allocation6], 0 }
   0x5   :  { %14 = vsyncpa [#allocation6 + $0x1], 0 }
   0x6   :  { %15 = vsyncpa [#allocation4], 0 }
   0x7   :  { %17 = vsyncpa [#allocation4 + $0x1], 0 }
   0x8   :  { %18 = vsyncpa [#allocation9], 0 }
   0x9   :  { %20 = vsyncpa [#allocation9 + $0x1], 0  ;;  %s805_s12 = smov 0   ;;  %s807_s13 = smov 0  }
   0xa   :  { %s809_s14 = smov 0   ;;  %s811_s15 = smov 0  }
   0xb   :  { %s813_s16 = smov 0   ;;  %s815_s17 = smov 0  }
   0xc LB: > { %s504_s18 = sadd.s32 4294967295, %s780_s17   ;;  %s505_s19 = sadd.s32 4294967294, %s780_s17   ;;  %s780_s17 = sphi %s815_s17, %s26_s17   ;;  %s776_s16 = sphi %s813_s16, %s989_s16   ;;  %s772_s15 = sphi %s811_s15, %s988_s15   ;;  %s768_s14 = sphi %s809_s14, %s987_s14   ;;  %s764_s13 = sphi %s807_s13, %s986_s13   ;;  %s760_s12 = sphi %s805_s12, %s985_s12  }
   0xd   : > { %s45_s20 = sadd.s32 1, %s776_s16  ;;  %s56_s21 = sadd.s32 1, %s768_s14 }
   0xe   : > { %p47_p0 = scmp.ge.s32.totalorder %s45_s20, 2  ;;  %p63_p1 = scmp.ne.s32.totalorder %s768_s14, %s764_s13 }
   0xf   : > { %p64_p2 = scmp.eq.s32.totalorder %s780_s17, 0  ;;  %p69_p3 = scmp.ne.s32.totalorder %s764_s13, %s760_s12 }
  0x10   : > { %s991_s20 = smov (%p47_p0, %s45_s20), 0  ;;  %p70_p5 = scmp.eq.s32.totalorder %s504_s18, 0 }
  0x11   : > { %p846_p4 = por %p64_p2, %p63_p1  ;;  %s51_s23 = ssub.s32 %s776_s16, %s991_s20 }
  0x12   : > { %p125_p6 = scmp.eq.s32.totalorder %s504_s18, 1  ;;  %p54_p7 = scmp.eq.s32.totalorder %s51_s23, 0 }
  0x13   : > { %p852_p8 = por %p70_p5, %p69_p3  ;;  %p131_p10 = scmp.eq.s32.totalorder %s505_s19, 1 }
  0x14   : > { %p856_p9 = por %p125_p6, %p63_p1  ;;  %p507_p12 = scmp.ge.s32.totalorder %s780_s17, 2 }
  0x15   : > { %s861_s26 = scalar_select %p54_p7, %s768_s14, %s56_s21  }
  0x16   : > { %p863_p11 = por %p131_p10, %p69_p3  ;;  %p549_p13 = scmp.lt.s32.totalorder %s780_s17, 2 }
  0x17   : > { %s870_s28 = sand.u32 1, %s768_s14   ;;  %s525_s30 = sshll.u32 %s776_s16, 5 }
  0x18   : > { %s508_s29 = sshll.u32 %s870_s28, 5  ;;  %s983_s0 = sld [smem:[#allocation14_spill]] }
  0x19   : > { %s183_s7 = scalar_lea.vmem [#allocation2], %s508_s29  ;;  %p879_p0 = pnand %p549_p13, %p846_p4 }
  0x1a   : > { %s193_s8 = sshll.u32 %s183_s7, 4  ;;  %p514_p1 = scmp.ge.s32.totalorder %s780_s17, 1  ;;  %s194_s8 = int_to_ptr.vmem [resolvable:$true] %s193_s8 }
  0x1b   : > { %s180_s11 = scalar_lea.sflag [#allocation3], %s870_s28  ;;  %s782_s18 = smov 128  }
  0x1c   : > { %s783_s19 = smov 8   ;;  %p225_p2 = scmp.lt.s32.totalorder %s780_s17, 3 }
  0x1d   : > { %s214_s4 = scalar_lea.hbm %s975_s1, %s525_s30  ;;  %s207_s22 = scalar_lea.vmem [#allocation5], %s508_s29 }
  0x1e   : > { %s190_s6 = scalar_lea.hbm %s983_s0, %s525_s30  ;;  %p226_p3 = pnand %p514_p1, %p225_p2 }
  0x1f   : > { %s191_s9 = sshll.u32 %s190_s6, 4  ;;  %s215_s5 = sshll.u32 %s214_s4, 4  ;;  %s192_s9 = int_to_ptr.hbm [resolvable:$true] %s191_s9  ;;  %s216_s5 = int_to_ptr.hbm [resolvable:$true] %s215_s5 }
  0x20   : > { %538 = dma.hbm_to_vmem [thread:$0]  (!%p879_p0), %s192_s9, 512, %s194_s8, %s180_s11, %s782_s18, %s782_s18, %s783_s19  }
  0x21   : > { %s217_s6 = sshll.u32 %s207_s22, 4  ;;  %s204_s7 = scalar_lea.sflag [#allocation6], %s870_s28  ;;  %s218_s6 = int_to_ptr.vmem [resolvable:$true] %s217_s6 }
  0x22   : > { %541 = dma.hbm_to_vmem [thread:$0]  (!%p879_p0), %s216_s5, 512, %s218_s6, %s204_s7, %s782_s18, %s782_s18, %s783_s19  }
  0x23   : > { %229 = sbr.rel (%p226_p3) target bundleno = 72 (0x48), region = 28  ;;  %s895_s0 = sand.u32 (!%p226_p3), 1, %s764_s13  }
  0x24   : > { %s515_s8 = sshll.u32 (!%p226_p3), %s895_s0, 5  ;;  %s232_s9 = scalar_lea.sflag (!%p226_p3), [#allocation3], %s895_s0 }
  0x25   : > { %s235_s11 = scalar_lea.vmem (!%p226_p3), [#allocation2], %s515_s8 }
  0x28   : > { %743 = dma.done.wait (%p852_p8), %s232_s9, 512  }
  0x29   : > { %745 = vsyncadd (%p852_p8), %s232_s9, 4294966784  ;;  %s242_s28 = scalar_lea.sflag [#allocation6], %s895_s0  ;;  %s245_s29 = scalar_lea.vmem [#allocation5], %s515_s8 }
  0x2a   : > { %747 = dma.done.wait (%p852_p8), %s242_s28, 512  }
  0x2b   : > { %749 = vsyncadd (%p852_p8), %s242_s28, 4294966784  ;;  %s517_s30 = sshll.u32 %s895_s0, 3  ;;  %s521_s10 = sshll.u32 %s772_s15, 3  ;;  %v287_v0 = vld [vmem:[%s235_s11] sm:$0xff]  ;;  %v288_v2 = vld [vmem:[%s235_s11 + $0x8] sm:$0xff]  ;;  %v784_v7 = vmov 0.0  }
  0x2c   : > { %s354_s21 = scalar_lea.hbm %s977_s3, %s521_s10  ;;  %v291_v1 = vld [vmem:[%s245_s29] sm:$0xff]  ;;  %s278_s23 = scalar_lea.vmem [#allocation8], %s517_s30  ;;  %v289_v4 = vld [vmem:[%s235_s11 + $0x10] sm:$0xff]  ;;  %v290_v5 = vld [vmem:[%s235_s11 + $0x18] sm:$0xff] }
  0x2d   : > { %s356_s4 = sshll.u32 %s278_s23, 4  ;;  %s358_s5 = sshll.u32 %s354_s21, 4  ;;  %vm295_vm0 = vcmp.gt.f32.partialorder %v291_v1, -100.0  ;;  %v296_v3 = vsub.f32 %v287_v0, %v291_v1  ;;  %v292_v6 = vld [vmem:[%s245_s29 + $0x8] sm:$0xff]  ;;  %v293_v9 = vld [vmem:[%s245_s29 + $0x10] sm:$0xff]  ;;  %v294_v10 = vld [vmem:[%s245_s29 + $0x18] sm:$0xff]  ;;  %s357_s4 = int_to_ptr.vmem [resolvable:$true] %s356_s4  ;;  %s359_s5 = int_to_ptr.hbm [resolvable:$true] %s358_s5 }
  0x2e   : > { %v314_v8 = vsel %vm295_vm0, 1.0, %v784_v7  ;;  %v297_v11 = vsub.f32 %v288_v2, %v292_v6  ;;  %v298_v13 = vsub.f32 %v289_v4, %v293_v9  ;;  %v299_v14 = vsub.f32 %v290_v5, %v294_v10  ;;  %s328_s24 = scalar_lea.sflag [#allocation9], %s895_s0  ;;  %s676_s22 = sshra.s32 %s359_s5, 4  ;;  %s677_s22 = int_to_ptr.hbm [resolvable:$true] %s676_s22 }
  0x2f   : > { %v300_v12 = vand.u32 2147483647, %v296_v3  ;;  %321 = vst [vmem:[%s278_s23] sm:$0xff] %v314_v8  ;;  %s678_s6 = scalar_lea.hbm %s677_s22, 8  ;;  %s682_s9 = scalar_lea.hbm %s977_s3, 16 }
  0x30   : > { %v301_v15 = vand.u32 2147483647, %v297_v11  ;;  %v302_v16 = vand.u32 2147483647, %v298_v13  ;;  %v303_v17 = vand.u32 2147483647, %v299_v14  ;;  %p679_p4 = scmp.ne.s32.totalorder %s677_s22, %s678_s6  ;;  %p683_p7 = scmp.lt.s32.totalorder %s677_s22, %s977_s3 }
  0x31   : > { %v306_v18 = vsel %vm295_vm0, %v300_v12, 0.0  ;;  %p684_p8 = scmp.lt.s32.totalorder %s682_s9, %s678_s6 }
  0x32   : > { %v307_v19 = vsel %vm295_vm0, %v301_v15, 0.0  ;;  %p680_p5 = pnand %p679_p4, %p856_p9 }
  0x33   : > { %p685_p10 = por %p684_p8, %p683_p7 }
  0x34   : > { %p681_p6 = pneg %p680_p5 }
  0x36   : > { %p686_p13 = pnand %p685_p10, %p681_p6 }
  0x38   : > { %689 = shalt.err (!%p686_p13)
}
  0x39   : > { %532 = dma.vmem_to_hbm [thread:$0]  (%p856_p9), %s357_s4, 128, %s359_s5, %s328_s24   ;;  %v308_v20 = vsel %vm295_vm0, %v302_v16, 0.0  ;;  %v310_v21 = vadd.f32 %v307_v19, %v306_v18  ;;  %v309_v22 = vsel %vm295_vm0, %v303_v17, 0.0 }
  0x3a   : > { %s339_s19 = scalar_lea.hbm %s976_s2, %s521_s10  ;;  %s271_s21 = scalar_lea.vmem [#allocation7], %s517_s30 }
  0x3b   : > { %v311_v23 = vadd.f32 %v310_v21, %v308_v20  ;;  %s341_s23 = sshll.u32 %s271_s21, 4  ;;  %s343_s22 = sshll.u32 %s339_s19, 4  ;;  %s342_s23 = int_to_ptr.vmem [resolvable:$true] %s341_s23  ;;  %s344_s22 = int_to_ptr.hbm [resolvable:$true] %s343_s22 }
  0x3c   : > { %s323_s4 = scalar_lea.sflag [#allocation4], %s895_s0  ;;  %s704_s5 = sshra.s32 %s344_s22, 4  ;;  %s705_s5 = int_to_ptr.hbm [resolvable:$true] %s704_s5 }
  0x3d   : > { %v312_v24 = vadd.f32 %v311_v23, %v309_v22  ;;  %s706_s15 = scalar_lea.hbm %s705_s5, 8  ;;  %s710_s6 = scalar_lea.hbm %s976_s2, 16 }
  0x3e   : > { %p707_p0 = scmp.ne.s32.totalorder %s705_s5, %s706_s15  ;;  %p711_p3 = scmp.lt.s32.totalorder %s705_s5, %s976_s2 }
  0x3f   : > { %318 = vst [vmem:[%s271_s21] sm:$0xff] %v312_v24  ;;  %p712_p4 = scmp.lt.s32.totalorder %s710_s6, %s706_s15 }
  0x40   : > { %p708_p1 = pnand %p707_p0, %p856_p9 }
  0x41   : > { %p713_p5 = por %p712_p4, %p711_p3 }
  0x42   : > { %p709_p2 = pneg %p708_p1 }
  0x44   : > { %p714_p6 = pnand %p713_p5, %p709_p2 }
  0x46   : > { %717 = shalt.err (!%p714_p6)
}
  0x47   : > { %531 = dma.vmem_to_hbm [thread:$0]  (%p856_p9), %s342_s23, 128, %s344_s22, %s323_s4  }
  0x48 PF: > { %s370_s0 = sand.u32 1, %s760_s12   ;;  %p543_p7 = pnand %p507_p12, %p863_p11 }
  0x49   : > { %s371_s8 = scalar_lea.sflag [#allocation4], %s370_s0 }
  0x4a   : > { %p544_p8 = pneg %p543_p7 }
  0x4c   : > { %751 = dma.done.wait (%p544_p8), %s371_s8, 128  }
  0x4d   : > { %753 = vsyncadd (%p544_p8), %s371_s8, 4294967168  ;;  %s381_s9 = scalar_lea.sflag [#allocation9], %s370_s0 }
  0x4e   : > { %755 = dma.done.wait (%p544_p8), %s381_s9, 128  }
  0x4f   : > { %757 = vsyncadd (%p544_p8), %s381_s9, 4294967168  ;;  %s26_s17 = sadd.s32 1, %s780_s17   ;;  %s985_s12 = smov %s764_s13 }
  0x50   : > { %p23_p10 = scmp.ge.s32.totalorder %s26_s17, 4   ;;  %s986_s13 = smov %s768_s14 }
  0x51   : > { %s987_s14 = smov %s861_s26  ;;  %s988_s15 = smov %s776_s16 }
  0x52   : > { %s989_s16 = smov %s991_s20  ;;  %25 = sbr.rel (!%p23_p10) target bundleno = 12 (0xc), region = 107 }
  0x57   :  { %387 = vsyncpa [#allocation3], 1 }
  0x58   :  { %389 = vsyncpa [#allocation3 + $0x1], 1 }
  0x59   :  { %390 = vsyncpa [#allocation6], 1 }
  0x5a   :  { %392 = vsyncpa [#allocation6 + $0x1], 1 }
  0x5b   :  { %393 = vsyncpa [#allocation4], 1 }
  0x5c   :  { %395 = vsyncpa [#allocation4 + $0x1], 1 }
  0x5d   :  { %396 = vsyncpa [#allocation9], 1 }
  0x5e   :  { %398 = vsyncpa [#allocation9 + $0x1], 1 }

</bundles_post_ra>
